<compile_context>
chip_gen: v6e
topology: v6e:2x2x1
jax: 0.10.0
libtpu: 0.0.40
codegen_flags: <defaults>
</compile_context>

<pallas_src>
import math

import jax
import jax.numpy as jnp
from jax import lax
from jax.experimental import pallas as pl
from jax.experimental.pallas import tpu as pltpu

_INV_LN10 = 1.0 / math.log(10.0)


def snr_attention_kernel(x_ref, o_ref):
    # x_ref block: (bb, C, L) float32 ; o_ref block: (bb, C, 1) float32
    x = x_ref[...]
    L = x.shape[-1]

    # Neighbor x[i+1] with zero right-pad: rotate left by one along lanes
    # (== roll by L-1) and zero the wrapped-around lane L-1.
    shifted = pltpu.roll(x, shift=L - 1, axis=x.ndim - 1)
    lane = lax.broadcasted_iota(jnp.int32, (1, 1, L), 2)
    keep = (lane < (L - 1)).astype(x.dtype)            # (1, 1, L), broadcast
    p2 = x + shifted * keep                            # == 2 * avg_pool(x)

    # SNR = max(spec) / sum(spec); the common 0.5 factor cancels exactly.
    mx = jnp.max(p2, axis=-1, keepdims=True)           # (bb, C, 1)
    sm = jnp.sum(p2, axis=-1, keepdims=True)           # (bb, C, 1)
    snr = jnp.log(mx / sm) * jnp.float32(_INV_LN10)    # log10(max/sum)

    # Softmax over channels (dim=1), numerically stable.
    z = snr - jnp.max(snr, axis=1, keepdims=True)
    e = jnp.exp(z)
    o_ref[...] = (e / jnp.sum(e, axis=1, keepdims=True)).astype(o_ref.dtype)


def snr_attention(sig_fft, *, batch_block=None):
    """sig_fft: (B, C, L) -> (B, C, 1) float32 channel-attention (softmax over C)."""
    x = sig_fft.astype(jnp.float32)
    B, C, L = x.shape

    if batch_block is None:
        # Target a multi-MiB input tile; stays well under VMEM (double-buffered)
        # even on v7x's 64 MiB.
        target_bytes = 4 * 1024 * 1024
        batch_block = max(1, target_bytes // max(1, C * L * 4))
    bb = int(min(B, batch_block))
    grid = (pl.cdiv(B, bb),)

    return pl.pallas_call(
        snr_attention_kernel,
        out_shape=jax.ShapeDtypeStruct((B, C, 1), jnp.float32),
        grid_spec=pltpu.PrefetchScalarGridSpec(
            num_scalar_prefetch=0,
            grid=grid,
            in_specs=[pl.BlockSpec((bb, C, L), lambda i: (i, 0, 0))],
            out_specs=pl.BlockSpec((bb, C, 1), lambda i: (i, 0, 0)),
        ),
        compiler_params=pltpu.CompilerParams(
            dimension_semantics=("parallel",),
        ),
    )(x)


def _reference(sig_fft):
    """Pure-JAX mirror of the PyTorch forward for the correctness check."""
    x = sig_fft.astype(jnp.float32)
    xp = jnp.pad(x, ((0, 0), (0, 0), (0, 1)))
    spec = (xp[..., :-1] + xp[..., 1:]) * 0.5
    snr = jnp.max(spec, axis=-1, keepdims=True) / jnp.sum(spec, axis=-1, keepdims=True)
    snr = jnp.log(snr) / jnp.log(jnp.float32(10.0))
    return jax.nn.softmax(snr, axis=1)


if __name__ == "__main__":
    key = jax.random.PRNGKey(0)
    B, C, L = 2, 4, 128  # (batch, channels, spectral bins)
    # FFT-magnitude-like non-negative input
    sig_fft = jnp.abs(jax.random.normal(key, (B, C, L), dtype=jnp.float32))

    out = snr_attention(sig_fft)
    out = jax.block_until_ready(out)

    ref = _reference(sig_fft)
    assert out.shape == (B, C, 1) and out.dtype == jnp.float32
    assert bool(jnp.allclose(out, ref, rtol=1e-5, atol=1e-6)), "mismatch vs reference"
    assert bool(jnp.allclose(jnp.sum(out, axis=1), 1.0, rtol=1e-5, atol=1e-6))

    print("KERNEL_OK")
</pallas_src>

<mosaic_0001>
module attributes {stable_mosaic.version = 11 : i64} {
  func.func @snr_attention_kernel(%arg0: i32, %arg1: memref<2x4x128xf32, #tpu.memory_space<vmem>>, %arg2: memref<2x4x1xf32, #tpu.memory_space<vmem>>) attributes {dimension_semantics = [#tpu.dimension_semantics<parallel>], iteration_bounds = array<i64: 1>, scalar_prefetch = 0 : i64, scratch_operands = 0 : i64, tpu.core_type = #tpu.core_type<tc>, window_params = [{transform_indices = @transform_0, window_bounds = array<i64: 2, 4, 128>}, {transform_indices = @transform_1, window_bounds = array<i64: 2, 4, 1>}]} {
    %c0 = arith.constant 0 : index
    %c0_0 = arith.constant 0 : index
    %c0_1 = arith.constant 0 : index
    %0 = vector.load %arg1[%c0, %c0_0, %c0_1] : memref<2x4x128xf32, #tpu.memory_space<vmem>>, vector<2x4x128xf32>
    %c127_i32 = arith.constant 127 : i32
    %1 = tpu.dynamic_rotate %0 by %c127_i32 dim 2 : vector<2x4x128xf32>, i32 -> vector<2x4x128xf32>
    %2 = tpu.iota {dimensions = array<i32: 2>} : vector<1x1x128xi32>
    %c127_i32_2 = arith.constant 127 : i32
    %3 = vector.broadcast %c127_i32_2 : i32 to vector<1x1x128xi32>
    %4 = arith.cmpi slt, %2, %3 : vector<1x1x128xi32>
    %5 = arith.extui %4 : vector<1x1x128xi1> to vector<1x1x128xi32>
    %6 = arith.sitofp %5 : vector<1x1x128xi32> to vector<1x1x128xf32>
    %7 = vector.broadcast %6 : vector<1x1x128xf32> to vector<2x4x128xf32>
    %8 = arith.mulf %1, %7 : vector<2x4x128xf32>
    %9 = arith.addf %0, %8 : vector<2x4x128xf32>
    %cst = arith.constant dense<0xFF800000> : vector<2x4xf32>
    %10 = vector.multi_reduction <maximumf>, %9, %cst [2] : vector<2x4x128xf32> to vector<2x4xf32>
    %11 = vector.shape_cast %10 : vector<2x4xf32> to vector<2x4x1xf32>
    %cst_3 = arith.constant dense<0.000000e+00> : vector<2x4xf32>
    %12 = vector.multi_reduction <add>, %9, %cst_3 [2] : vector<2x4x128xf32> to vector<2x4xf32>
    %13 = vector.shape_cast %12 : vector<2x4xf32> to vector<2x4x1xf32>
    %14 = arith.divf %11, %13 : vector<2x4x1xf32>
    %15 = math.log %14 : vector<2x4x1xf32>
    %cst_4 = arith.constant 0.434294492 : f32
    %16 = vector.broadcast %cst_4 : f32 to vector<2x4x1xf32>
    %17 = arith.mulf %15, %16 : vector<2x4x1xf32>
    %cst_5 = arith.constant dense<0xFF800000> : vector<2x1xf32>
    %18 = vector.multi_reduction <maximumf>, %17, %cst_5 [1] : vector<2x4x1xf32> to vector<2x1xf32>
    %19 = vector.shape_cast %18 : vector<2x1xf32> to vector<2x1x1xf32>
    %20 = vector.broadcast %19 : vector<2x1x1xf32> to vector<2x4x1xf32>
    %21 = arith.subf %17, %20 : vector<2x4x1xf32>
    %22 = math.exp %21 : vector<2x4x1xf32>
    %cst_6 = arith.constant dense<0.000000e+00> : vector<2x1xf32>
    %23 = vector.multi_reduction <add>, %22, %cst_6 [1] : vector<2x4x1xf32> to vector<2x1xf32>
    %24 = vector.shape_cast %23 : vector<2x1xf32> to vector<2x1x1xf32>
    %25 = vector.broadcast %24 : vector<2x1x1xf32> to vector<2x4x1xf32>
    %26 = arith.divf %22, %25 : vector<2x4x1xf32>
    %c0_7 = arith.constant 0 : index
    %c0_8 = arith.constant 0 : index
    %c0_9 = arith.constant 0 : index
    %27 = vector.load %arg2[%c0_7, %c0_8, %c0_9] : memref<2x4x1xf32, #tpu.memory_space<vmem>>, vector<2x4x1xf32>
    tpu.vector_store %arg2[%c0_7, %c0_8, %c0_9], %26 {strides = array<i32>} : memref<2x4x1xf32, #tpu.memory_space<vmem>>, vector<2x4x1xf32>,
    return
  }
  func.func @transform_0(%arg0: i32) -> (i32, i32, i32) {
    %c0_i32 = arith.constant 0 : i32
    %c0_i32_0 = arith.constant 0 : i32
    %c0_i32_1 = arith.constant 0 : i32
    return %arg0, %c0_i32, %c0_i32_0 : i32, i32, i32
  }
  func.func @transform_1(%arg0: i32) -> (i32, i32, i32) {
    %c0_i32 = arith.constant 0 : i32
    %c0_i32_0 = arith.constant 0 : i32
    %c0_i32_1 = arith.constant 0 : i32
    return %arg0, %c0_i32, %c0_i32_0 : i32, i32, i32
  }
}

</mosaic_0001>

<bundles_post_ra>
// kernel: tpu_custom_call.1
= control target key start
LH: loop header
LB: loop body
LE: loop exit
PB: predicated region body
PF: predicated region fallthrough
CT: control target
= control target key end

     0   :  { %6 = vsyncpa [#allocation3], 0  ;;  %s150_s6 = smov [#allocation2]   ;;  %s182_s0 = inlined_call_operand.hbm [shape: f32[2,4,128], index: 0, kind: input, shape index: {}]   ;;  %s183_s1 = inlined_call_operand.vmem [shape: f32[2,4,1], index: 1, kind: output, shape index: {}]  }
   0x1   :  { %s12_s7 = sshll.u32 %s150_s6, 4  ;;  %s13_s7 = int_to_ptr.vmem [resolvable:$true] %s12_s7 }
   0x2   :  { %s136_s8 = scalar_lea.vmem %s13_s7, 128  ;;  %p141_p1 = scmp.lt.s32.totalorder %s13_s7, %s13_s7 }
   0x3   :  { %p137_p0 = scmp.ne.s32.totalorder %s13_s7, %s136_s8  ;;  %p142_p2 = scmp.lt.s32.totalorder %s136_s8, %s136_s8 }
   0x5   :  { %p143_p3 = por %p142_p2, %p141_p1 }
   0x7   :  { %p144_p4 = pnand %p143_p3, %p137_p0 }
   0x9   :  { %147 = shalt.err (!%p144_p4)
}
   0xa   :  { %s151_s9 = smov 64   ;;  %s152_s10 = smov 4  }
   0xb   :  { %18 = dma.hbm_to_vmem [thread:$0]  %s182_s0, 128, %s13_s7, [#allocation3], %s151_s9, %s151_s9, %s152_s10  }
   0xc   :  { %148 = dma.done.wait [#allocation3], 128  }
   0xd   :  { %149 = vsyncadd [#allocation3], 4294967168  ;;  %v22_v0 = vld [vmem:[#allocation2] sm:$0xf]  ;;  %s153_s13 = smov 127   ;;  %v28_v2 = vlaneseq  ;;  %v154_v4 = vmov 0.0  }
   0xe   :  { %24 = vrot.lane.b32.xlu0 %v22_v0, %s153_s13  ;;  %v23_v1 = vld [vmem:[#allocation2 + $0x4] sm:$0xf]  ;;  %vm37_vm1 = vcmask 1043456   ;;  %vm98_vm2 = vcmask 3072  }
   0xf   :  { %v29_v3 = vand.u32 127, %v28_v2 }
  0x11   :  { %vm30_vm0 = vcmp.lt.s32.totalorder %v29_v3, 127 }
  0x12   :  { %26 = vrot.lane.b32.xlu0 %v23_v1, %s153_s13  ;;  %v106_v5 = vsel %vm30_vm0, 1.0, %v154_v4 }
  0x80   :  { %v25_v6 = vpop.permute.xlu0 %24 }
  0x81   :  { %v33_v7 = vmul.f32 %v106_v5, %v25_v6 }
  0x83   :  { %v35_v8 = vadd.f32 %v33_v7, %v22_v0 }
  0x84   :  { %v27_v9 = vpop.permute.xlu0 %26 }
  0x85   :  { %v34_v10 = vmul.f32 %v106_v5, %v27_v9  ;;  %v44_v11 = vsel %vm37_vm1, %v35_v8, 0.0  ;;  %v38_v12 = vsel %vm37_vm1, %v35_v8, -inf }
  0x86   :  { %45 = vadd.xlane.f32.xlu1 %v44_v11  ;;  %39 = vmax.xlane.f32.xlu0 %v38_v12 }
  0x87   :  { %v36_v13 = vadd.f32 %v34_v10, %v23_v1 }
  0x89   :  { %v47_v14 = vsel %vm37_vm1, %v36_v13, 0.0  ;;  %v41_v15 = vsel %vm37_vm1, %v36_v13, -inf }
  0x8a   :  { %48 = vadd.xlane.f32.xlu1 %v47_v14 }
  0x8e   :  { %42 = vmax.xlane.f32.xlu1 %v41_v15 }
 0x10f   :  { %v46_v16 = vpop.xlane.xlu1 %45  ;;  %v40_v19 = vpop.xlane.xlu0 %39 }
 0x110   :  { %112 = vrcp.f32 %v46_v16 }
 0x113   :  { %v49_v17 = vpop.xlane.xlu1 %48 }
 0x114   :  { %114 = vrcp.f32 %v49_v17 }
 0x117   :  { %v43_v22 = vpop.xlane.xlu1 %42 }
 0x11d   :  { %v113_v18 = vpop.eup %112 }
 0x11e   :  { %v51_v20 = vmul.f32 %v113_v18, %v40_v19 }
 0x120   :  { %116 = vlog2.f32 %v51_v20 }
 0x121   :  { %v115_v21 = vpop.eup %114 }
 0x122   :  { %v53_v23 = vmul.f32 %v115_v21, %v43_v22 }
 0x124   :  { %118 = vlog2.f32 %v53_v23 }
 0x12d   :  { %v117_v24 = vpop.eup %116 }
 0x12e   :  { %v55_v25 = vmul.f32 0.6931472, %v117_v24 }
 0x130   :  { %v58_v26 = vmul.f32 0.4342945, %v55_v25 }
 0x131   :  { %v119_v27 = vpop.eup %118 }
 0x132   :  { %v60_v28 = vsel %vm37_vm1, %v58_v26, -inf  ;;  %v57_v29 = vmul.f32 0.6931472, %v119_v27 }
 0x133   :  { %v61_v30 = vrot.slane %v60_v28, 4 }
 0x134   :  { %v59_v31 = vmul.f32 0.4342945, %v57_v29 }
 0x135   :  { %v62_v32 = vmax.f32 %v60_v28, %v61_v30 }
 0x136   :  { %v67_v33 = vsel %vm37_vm1, %v59_v31, -inf }
 0x137   :  { %v63_v34 = vrot.slane %v62_v32, 2  ;;  %v68_v35 = vrot.slane %v67_v33, 4 }
 0x139   :  { %v64_v36 = vmax.f32 %v62_v32, %v63_v34  ;;  %v69_v37 = vmax.f32 %v67_v33, %v68_v35 }
 0x13b   :  { %v65_v38 = vrot.slane %v64_v36, 1  ;;  %v70_v39 = vrot.slane %v69_v37, 2 }
 0x13d   :  { %v66_v40 = vmax.f32 %v64_v36, %v65_v38  ;;  %v71_v41 = vmax.f32 %v69_v37, %v70_v39 }
 0x13f   :  { %v74_v42 = vsub.f32 %v58_v26, %v66_v40  ;;  %v72_v43 = vrot.slane %v71_v41, 1 }
 0x141   :  { %v76_v44 = vmul.f32 1.442695, %v74_v42  ;;  %v73_v45 = vmax.f32 %v71_v41, %v72_v43 }
 0x143   :  { %120 = vpow2.f32 %v76_v44  ;;  %v75_v46 = vsub.f32 %v59_v31, %v73_v45 }
 0x145   :  { %v78_v47 = vmul.f32 1.442695, %v75_v46 }
 0x147   :  { %122 = vpow2.f32 %v78_v47 }
 0x150   :  { %v121_v48 = vpop.eup %120 }
 0x151   :  { %v80_v49 = vsel %vm37_vm1, %v121_v48, 0.0 }
 0x152   :  { %v81_v50 = vrot.slane %v80_v49, 4 }
 0x154   :  { %v123_v51 = vpop.eup %122  ;;  %v82_v52 = vadd.f32 %v81_v50, %v80_v49 }
 0x155   :  { %v87_v53 = vsel %vm37_vm1, %v123_v51, 0.0 }
 0x156   :  { %v83_v54 = vrot.slane %v82_v52, 2  ;;  %v88_v55 = vrot.slane %v87_v53, 4 }
 0x158   :  { %v84_v56 = vadd.f32 %v83_v54, %v82_v52  ;;  %v89_v57 = vadd.f32 %v88_v55, %v87_v53 }
 0x15a   :  { %v85_v58 = vrot.slane %v84_v56, 1  ;;  %v90_v59 = vrot.slane %v89_v57, 2 }
 0x15c   :  { %v86_v60 = vadd.f32 %v85_v58, %v84_v56  ;;  %v91_v61 = vadd.f32 %v90_v59, %v89_v57 }
 0x15e   :  { %124 = vrcp.f32 %v86_v60  ;;  %v92_v62 = vrot.slane %v91_v61, 1 }
 0x160   :  { %v93_v63 = vadd.f32 %v92_v62, %v91_v61 }
 0x162   :  { %126 = vrcp.f32 %v93_v63 }
 0x16b   :  { %v125_v0 = vpop.eup %124 }
 0x16c   :  { %v95_v1 = vmul.f32 %v125_v0, %v121_v48 }
 0x16e   :  { %99 = vst.msk [vmem:[%s183_s1] sm:$0xf] %vm98_vm2, %v95_v1 }
 0x16f   :  { %v127_v2 = vpop.eup %126 }
 0x170   :  { %v97_v3 = vmul.f32 %v127_v2, %v123_v51 }
 0x172   :  { %100 = vst.msk [vmem:[%s183_s1 + $0x4] sm:$0xf] %vm98_vm2, %v97_v3 }
 0x173   :  { %105 = vsyncpa [#allocation3], 1 }

</bundles_post_ra>
